<compile_context>
chip_gen: v6e
topology: v6e:2x2x1
jax: 0.10.0
libtpu: 0.0.40
codegen_flags: <defaults>
</compile_context>

<pallas_src>
import functools

import jax
import jax.numpy as jnp
from jax.experimental import pallas as pl
from jax.experimental.pallas import tpu as pltpu


def tmf_block_kernel(
    idx_ud_ref,   # SMEM (Bp,) int32 : user * n_periods + itemage (scalar prefetch)
    item_ref,     # SMEM (Bp,) int32 : item index                 (scalar prefetch)
    bias_ref,     # VMEM (1, TB) f32 : precomputed bias block (gT + b + b_u + b_i)
    udyn_hbm,     # ANY  (n_users*n_periods, D) f32 : dynamic-user table (HBM)
    item_hbm,     # ANY  (n_items, D) f32           : item table (HBM)
    out_ref,      # VMEM (1, TB) f32 : lane-dense output block
    u_rows,       # VMEM (TB, D) f32 scratch : gathered user rows
    i_rows,       # VMEM (TB, D) f32 scratch : gathered item rows
    sem,          # DMA semaphores (2,)
    *,
    tb: int,
    apply_sigmoid: bool,
):
    base = pl.program_id(0) * tb

    # Issue all 2*TB row-gather DMAs for this block; they overlap in flight.
    @pl.loop(0, tb)
    def _(r):
        u_idx = idx_ud_ref[base + r]
        it_idx = item_ref[base + r]
        pltpu.make_async_copy(
            udyn_hbm.at[pl.ds(u_idx, 1)], u_rows.at[pl.ds(r, 1)], sem.at[0]
        ).start()
        pltpu.make_async_copy(
            item_hbm.at[pl.ds(it_idx, 1)], i_rows.at[pl.ds(r, 1)], sem.at[1]
        ).start()

    # Drain: one wait per issued copy (same byte count, same semaphore).
    @pl.loop(0, tb)
    def _(r):
        pltpu.make_async_copy(
            udyn_hbm.at[pl.ds(0, 1)], u_rows.at[pl.ds(r, 1)], sem.at[0]
        ).wait()
        pltpu.make_async_copy(
            item_hbm.at[pl.ds(0, 1)], i_rows.at[pl.ds(r, 1)], sem.at[1]
        ).wait()

    # v_u(t) . v_i for the whole block: VPU mul + lane reduce on (TB, D).
    scores = jnp.sum(u_rows[...] * i_rows[...], axis=-1)          # (TB,)
    val = scores.reshape(1, tb) + bias_ref[...]                   # (1, TB)
    if apply_sigmoid:
        val = jax.nn.sigmoid(val)
    out_ref[...] = val.astype(out_ref.dtype)                      # one dense store


def tmf_forward(user, item, itemage, params, n_periods, *, apply_sigmoid=False):
    """Pallas-backed TMF.forward. user/item/itemage: (B,) int. Returns (B,) f32."""
    b = user.shape[0]
    d = params["user_dyn_w"].shape[1]
    tbl_dtype = params["user_dyn_w"].dtype

    user_i = user.astype(jnp.int32)
    item_i = item.astype(jnp.int32)
    age_i = itemage.astype(jnp.int32)
    idx_ud = user_i * jnp.int32(n_periods) + age_i

    # Bias hoisted out of the kernel: one cheap XLA gather over B elements.
    bias = (params["gT_w"][age_i] + params["b"][0]
            + params["bu_w"][user_i] + params["bi_w"][item_i]).astype(jnp.float32)

    # Block size: 128 lanes when possible, otherwise one full-width block.
    if b >= 128:
        tb = 128
        bp = ((b + tb - 1) // tb) * tb
    else:
        tb = b
        bp = b

    pad = bp - b
    if pad:
        zeros_i = jnp.zeros((pad,), jnp.int32)     # padded rows gather row 0 (in range)
        idx_ud = jnp.concatenate([idx_ud, zeros_i])
        item_i = jnp.concatenate([item_i, zeros_i])
        bias = jnp.concatenate([bias, jnp.zeros((pad,), jnp.float32)])

    bias2d = bias.reshape(1, bp)
    n_blocks = bp // tb

    cost = pl.CostEstimate(
        flops=2 * bp * d,
        transcendentals=bp if apply_sigmoid else 0,
        bytes_accessed=2 * bp * d * 4 + 2 * bp * 4 + 2 * bp * 4,
    )

    out = pl.pallas_call(
        functools.partial(tmf_block_kernel, tb=tb, apply_sigmoid=apply_sigmoid),
        out_shape=jax.ShapeDtypeStruct((1, bp), jnp.float32),
        grid_spec=pltpu.PrefetchScalarGridSpec(
            num_scalar_prefetch=2,
            grid=(n_blocks,),
            in_specs=[
                # Precomputed bias, lane-dense (1, TB) blocks (auto-pipelined).
                pl.BlockSpec((1, tb), lambda i, idx_r, it_r: (0, i)),
                # Embedding tables stay in HBM; rows are DMA-gathered in-kernel.
                pl.BlockSpec(memory_space=pl.ANY),
                pl.BlockSpec(memory_space=pl.ANY),
            ],
            out_specs=pl.BlockSpec((1, tb), lambda i, idx_r, it_r: (0, i)),
            scratch_shapes=[
                pltpu.VMEM((tb, d), tbl_dtype),
                pltpu.VMEM((tb, d), tbl_dtype),
                pltpu.SemaphoreType.DMA((2,)),
            ],
        ),
        compiler_params=pltpu.CompilerParams(
            dimension_semantics=("parallel",),   # v7x: shard batch blocks over 2 TCs
        ),
        cost_estimate=cost,
    )(idx_ud, item_i, bias2d, params["user_dyn_w"], params["item_w"])
    return out[0, :b]


def tmf_forward_ref(user, item, itemage, params, n_periods, *, apply_sigmoid=False):
    """Pure-JAX reference (mirrors the PyTorch forward exactly)."""
    idx_ud = user * n_periods + itemage
    user_e = params["user_dyn_w"][idx_ud]          # (B, D)
    item_e = params["item_w"][item]                # (B, D)
    out = jnp.sum(user_e * item_e, axis=-1)
    out = out + params["gT_w"][itemage] + params["b"][0] \
              + params["bu_w"][user] + params["bi_w"][item]
    if apply_sigmoid:
        out = jax.nn.sigmoid(out)
    return out


def init_params(key, n_users, n_items, n_periods, embedding_size):
    """Deterministic xavier_normal_-style init for all embedding tables; b = 0."""
    def xavier_normal(key, shape):
        fan_in, fan_out = shape[0], shape[1]
        std = (2.0 / (fan_in + fan_out)) ** 0.5
        return std * jax.random.normal(key, shape, dtype=jnp.float32)

    k = jax.random.split(key, 6)
    return {
        # nn.Embedding(n_users * n_periods, D)
        "user_dyn_w": xavier_normal(k[0], (n_users * n_periods, embedding_size)),
        # nn.Embedding(n_items, D)
        "item_w": xavier_normal(k[1], (n_items, embedding_size)),
        # Bias embeddings stored flat (1D); gathered in the XLA wrapper.
        "bu_w": xavier_normal(k[2], (n_users, 1))[:, 0],
        "bi_w": xavier_normal(k[3], (n_items, 1))[:, 0],
        "gT_w": xavier_normal(k[4], (n_periods, 1))[:, 0],
        # Parameter(torch.Tensor(1)) is never touched by _init_weights (apply()
        # only visits modules) -> initialize deterministically to 0 here.
        "b": jnp.zeros((1,), dtype=jnp.float32),
    }


def _run_case(key, n_users, n_items, n_periods, emb, batch, apply_sigmoid):
    kp, ku, ki, ka = jax.random.split(key, 4)
    params = init_params(kp, n_users, n_items, n_periods, emb)
    user = jax.random.randint(ku, (batch,), 0, n_users, dtype=jnp.int32)
    item = jax.random.randint(ki, (batch,), 0, n_items, dtype=jnp.int32)
    itemage = jax.random.randint(ka, (batch,), 0, n_periods, dtype=jnp.int32)

    out = tmf_forward(user, item, itemage, params, n_periods,
                      apply_sigmoid=apply_sigmoid)
    out = jax.block_until_ready(out)
    ref = tmf_forward_ref(user, item, itemage, params, n_periods,
                          apply_sigmoid=apply_sigmoid)
    assert out.shape == (batch,)
    assert jnp.allclose(out, ref, atol=1e-5, rtol=1e-5), (out, ref)


if __name__ == "__main__":
    key = jax.random.PRNGKey(0)
    k1, k2 = jax.random.split(key, 2)

    # Small config (loss_type='NLL' -> sigmoid): B=8 -> single (1, 8) block.
    _run_case(k1, n_users=6, n_items=10, n_periods=4, emb=32,
              batch=8, apply_sigmoid=True)

    # Larger config (no sigmoid): B=200 -> padded to 256, two 128-row blocks,
    # exercising the batched DMA gather and the parallel block axis.
    _run_case(k2, n_users=37, n_items=53, n_periods=5, emb=64,
              batch=200, apply_sigmoid=False)

    print("KERNEL_OK")
</pallas_src>

<mosaic_0001>
module attributes {stable_mosaic.version = 11 : i64} {
  func.func @tmf_block_kernel(%arg0: i32, %arg1: memref<8xi32, #tpu.memory_space<smem>>, %arg2: memref<8xi32, #tpu.memory_space<smem>>, %arg3: memref<1x8xf32, #tpu.memory_space<vmem>>, %arg4: memref<24x32xf32, #tpu.memory_space<any>>, %arg5: memref<10x32xf32, #tpu.memory_space<any>>, %arg6: memref<1x8xf32, #tpu.memory_space<vmem>>, %arg7: memref<8x32xf32, #tpu.memory_space<vmem>>, %arg8: memref<8x32xf32, #tpu.memory_space<vmem>>, %arg9: memref<2x!tpu.dma_semaphore, #tpu.memory_space<semaphore_mem>>) attributes {dimension_semantics = [#tpu.dimension_semantics<parallel>], iteration_bounds = array<i64: 1>, scalar_prefetch = 2 : i64, scratch_operands = 3 : i64, tpu.core_type = #tpu.core_type<tc>, window_params = [{transform_indices = @transform_0, window_bounds = array<i64: 1, 8>}, {}, {}, {transform_indices = @transform_3, window_bounds = array<i64: 1, 8>}]} {
    %c8_i32 = arith.constant 8 : i32
    %0 = arith.muli %arg0, %c8_i32 : i32
    %c0_i32 = arith.constant 0 : i32
    %c8_i32_0 = arith.constant 8 : i32
    %1 = arith.addi %c0_i32, %c8_i32_0 : i32
    %c1_i32 = arith.constant 1 : i32
    scf.for %arg10 = %c0_i32 to %1 step %c1_i32  : i32 {
      %c1_i32_14 = arith.constant 1 : i32
      %16 = arith.muli %arg10, %c1_i32_14 : i32
      %c0_i32_15 = arith.constant 0 : i32
      %17 = arith.addi %c0_i32_15, %16 : i32
      %18 = arith.addi %0, %17 : i32
      %19 = arith.index_cast %18 : i32 to index
      %20 = memref.load %arg1[%19] : memref<8xi32, #tpu.memory_space<smem>>
      %21 = arith.addi %0, %17 : i32
      %22 = arith.index_cast %21 : i32 to index
      %23 = memref.load %arg2[%22] : memref<8xi32, #tpu.memory_space<smem>>
      %c0_i32_16 = arith.constant 0 : i32
      %c0_i32_17 = arith.constant 0 : i32
      %24 = tpu.memref_slice %arg4[%20, %c0_i32_17] : memref<24x32xf32, #tpu.memory_space<any>> -> memref<1x32xf32, #tpu.memory_space<any>>
      %c0_i32_18 = arith.constant 0 : i32
      %25 = tpu.memref_slice %arg7[%17, %c0_i32_18] : memref<8x32xf32, #tpu.memory_space<vmem>> -> memref<1x32xf32, #tpu.memory_space<vmem>>
      %26 = tpu.memref_slice %arg9[%c0_i32_16] : memref<2x!tpu.dma_semaphore, #tpu.memory_space<semaphore_mem>> -> memref<1x!tpu.dma_semaphore, #tpu.memory_space<semaphore_mem>>
      %27 = tpu.memref_squeeze %26 : memref<1x!tpu.dma_semaphore, #tpu.memory_space<semaphore_mem>> -> memref<!tpu.dma_semaphore, #tpu.memory_space<semaphore_mem>>
      tpu.enqueue_dma source(%24 : memref<1x32xf32, #tpu.memory_space<any>>) target(%25 : memref<1x32xf32, #tpu.memory_space<vmem>>) target_semaphore(%27 : memref<!tpu.dma_semaphore, #tpu.memory_space<semaphore_mem>>)
      %c1_i32_19 = arith.constant 1 : i32
      %c0_i32_20 = arith.constant 0 : i32
      %28 = tpu.memref_slice %arg5[%23, %c0_i32_20] : memref<10x32xf32, #tpu.memory_space<any>> -> memref<1x32xf32, #tpu.memory_space<any>>
      %c0_i32_21 = arith.constant 0 : i32
      %29 = tpu.memref_slice %arg8[%17, %c0_i32_21] : memref<8x32xf32, #tpu.memory_space<vmem>> -> memref<1x32xf32, #tpu.memory_space<vmem>>
      %30 = tpu.memref_slice %arg9[%c1_i32_19] : memref<2x!tpu.dma_semaphore, #tpu.memory_space<semaphore_mem>> -> memref<1x!tpu.dma_semaphore, #tpu.memory_space<semaphore_mem>>
      %31 = tpu.memref_squeeze %30 : memref<1x!tpu.dma_semaphore, #tpu.memory_space<semaphore_mem>> -> memref<!tpu.dma_semaphore, #tpu.memory_space<semaphore_mem>>
      tpu.enqueue_dma source(%28 : memref<1x32xf32, #tpu.memory_space<any>>) target(%29 : memref<1x32xf32, #tpu.memory_space<vmem>>) target_semaphore(%31 : memref<!tpu.dma_semaphore, #tpu.memory_space<semaphore_mem>>)
    }
    %c8_i32_1 = arith.constant 8 : i32
    %c0_i32_2 = arith.constant 0 : i32
    %c8_i32_3 = arith.constant 8 : i32
    %2 = arith.addi %c0_i32_2, %c8_i32_3 : i32
    %c1_i32_4 = arith.constant 1 : i32
    scf.for %arg10 = %c0_i32_2 to %2 step %c1_i32_4  : i32 {
      %c1_i32_14 = arith.constant 1 : i32
      %16 = arith.muli %arg10, %c1_i32_14 : i32
      %c0_i32_15 = arith.constant 0 : i32
      %17 = arith.addi %c0_i32_15, %16 : i32
      %c0_i32_16 = arith.constant 0 : i32
      %c0_i32_17 = arith.constant 0 : i32
      %c0_i32_18 = arith.constant 0 : i32
      %18 = tpu.memref_slice %arg4[%c0_i32_17, %c0_i32_18] : memref<24x32xf32, #tpu.memory_space<any>> -> memref<1x32xf32, #tpu.memory_space<any>>
      %c0_i32_19 = arith.constant 0 : i32
      %19 = tpu.memref_slice %arg7[%17, %c0_i32_19] : memref<8x32xf32, #tpu.memory_space<vmem>> -> memref<1x32xf32, #tpu.memory_space<vmem>>
      %20 = tpu.memref_slice %arg9[%c0_i32_16] : memref<2x!tpu.dma_semaphore, #tpu.memory_space<semaphore_mem>> -> memref<1x!tpu.dma_semaphore, #tpu.memory_space<semaphore_mem>>
      %21 = tpu.memref_squeeze %20 : memref<1x!tpu.dma_semaphore, #tpu.memory_space<semaphore_mem>> -> memref<!tpu.dma_semaphore, #tpu.memory_space<semaphore_mem>>
      tpu.wait_dma2 semaphore(%21 : memref<!tpu.dma_semaphore, #tpu.memory_space<semaphore_mem>>) src(%18 : memref<1x32xf32, #tpu.memory_space<any>>) dst(%19 : memref<1x32xf32, #tpu.memory_space<vmem>>)
      %c1_i32_20 = arith.constant 1 : i32
      %c0_i32_21 = arith.constant 0 : i32
      %c0_i32_22 = arith.constant 0 : i32
      %22 = tpu.memref_slice %arg5[%c0_i32_21, %c0_i32_22] : memref<10x32xf32, #tpu.memory_space<any>> -> memref<1x32xf32, #tpu.memory_space<any>>
      %c0_i32_23 = arith.constant 0 : i32
      %23 = tpu.memref_slice %arg8[%17, %c0_i32_23] : memref<8x32xf32, #tpu.memory_space<vmem>> -> memref<1x32xf32, #tpu.memory_space<vmem>>
      %24 = tpu.memref_slice %arg9[%c1_i32_20] : memref<2x!tpu.dma_semaphore, #tpu.memory_space<semaphore_mem>> -> memref<1x!tpu.dma_semaphore, #tpu.memory_space<semaphore_mem>>
      %25 = tpu.memref_squeeze %24 : memref<1x!tpu.dma_semaphore, #tpu.memory_space<semaphore_mem>> -> memref<!tpu.dma_semaphore, #tpu.memory_space<semaphore_mem>>
      tpu.wait_dma2 semaphore(%25 : memref<!tpu.dma_semaphore, #tpu.memory_space<semaphore_mem>>) src(%22 : memref<1x32xf32, #tpu.memory_space<any>>) dst(%23 : memref<1x32xf32, #tpu.memory_space<vmem>>)
    }
    %c8_i32_5 = arith.constant 8 : i32
    %c0 = arith.constant 0 : index
    %c0_6 = arith.constant 0 : index
    %3 = vector.load %arg7[%c0, %c0_6] : memref<8x32xf32, #tpu.memory_space<vmem>>, vector<8x32xf32>
    %c0_7 = arith.constant 0 : index
    %c0_8 = arith.constant 0 : index
    %4 = vector.load %arg8[%c0_7, %c0_8] : memref<8x32xf32, #tpu.memory_space<vmem>>, vector<8x32xf32>
    %5 = arith.mulf %3, %4 : vector<8x32xf32>
    %cst = arith.constant dense<0.000000e+00> : vector<8xf32>
    %6 = vector.multi_reduction <add>, %5, %cst [1] : vector<8x32xf32> to vector<8xf32>
    %7 = vector.shape_cast %6 : vector<8xf32> to vector<1x8xf32>
    %c0_9 = arith.constant 0 : index
    %c0_10 = arith.constant 0 : index
    %8 = vector.load %arg3[%c0_9, %c0_10] : memref<1x8xf32, #tpu.memory_space<vmem>>, vector<1x8xf32>
    %9 = arith.addf %7, %8 : vector<1x8xf32>
    %10 = arith.negf %9 : vector<1x8xf32>
    %11 = math.exp %10 : vector<1x8xf32>
    %cst_11 = arith.constant 1.000000e+00 : f32
    %12 = vector.broadcast %cst_11 : f32 to vector<1x8xf32>
    %13 = arith.addf %12, %11 : vector<1x8xf32>
    %14 = arith.divf %12, %13 : vector<1x8xf32>
    %c0_12 = arith.constant 0 : index
    %c0_13 = arith.constant 0 : index
    %15 = vector.load %arg6[%c0_12, %c0_13] : memref<1x8xf32, #tpu.memory_space<vmem>>, vector<1x8xf32>
    tpu.vector_store %arg6[%c0_12, %c0_13], %14 {strides = array<i32>} : memref<1x8xf32, #tpu.memory_space<vmem>>, vector<1x8xf32>,
    return
  }
  func.func @transform_0(%arg0: i32, %arg1: memref<8xi32, #tpu.memory_space<smem>>, %arg2: memref<8xi32, #tpu.memory_space<smem>>) -> (i32, i32) {
    %c0_i32 = arith.constant 0 : i32
    %c0_i32_0 = arith.constant 0 : i32
    return %c0_i32, %arg0 : i32, i32
  }
  func.func @transform_3(%arg0: i32, %arg1: memref<8xi32, #tpu.memory_space<smem>>, %arg2: memref<8xi32, #tpu.memory_space<smem>>) -> (i32, i32) {
    %c0_i32 = arith.constant 0 : i32
    %c0_i32_0 = arith.constant 0 : i32
    return %c0_i32, %arg0 : i32, i32
  }
}

</mosaic_0001>

<bundles_post_ra>
// kernel: tpu_custom_call.1
= control target key start
LH: loop header
LB: loop body
LE: loop exit
PB: predicated region body
PF: predicated region fallthrough
CT: control target
= control target key end

     0   :  { %s292_s18 = smov [#allocation6]   ;;  %s379_s0 = inlined_call_operand.hbm [shape: s32[8], index: 0, kind: input, shape index: {}]   ;;  %s380_s2 = inlined_call_operand.vmem [shape: f32[1,8], index: 2, kind: input, shape index: {}]   ;;  %s381_s3 = inlined_call_operand.hbm [shape: f32[24,32], index: 3, kind: input, shape index: {}]   ;;  %s382_s4 = inlined_call_operand.hbm [shape: f32[10,32], index: 4, kind: input, shape index: {}]   ;;  %s383_s5 = inlined_call_operand.hbm [shape: f32[1,8], index: 5, kind: output, shape index: {}]   ;;  %s384_s1 = inlined_call_operand.vmem [shape: s32[8], index: 1, kind: input, shape index: {}]  }
   0x1   :  { %11 = dma.hbm_to_smem %s379_s0, 16, %s292_s18, [#allocation5] }
   0x2   :  { %s12_s23 = sshll.u32 %s384_s1, 4  ;;  %s13_s23 = int_to_ptr.vmem [resolvable:$true] %s12_s23 }
   0x3   :  { %s192_s24 = scalar_lea.vmem %s13_s23, 16  ;;  %p197_p1 = scmp.lt.s32.totalorder %s13_s23, %s13_s23 }
   0x4   :  { %p193_p0 = scmp.ne.s32.totalorder %s13_s23, %s192_s24  ;;  %p198_p2 = scmp.lt.s32.totalorder %s192_s24, %s192_s24 }
   0x6   :  { %p199_p3 = por %p198_p2, %p197_p1 }
   0x8   :  { %p200_p4 = pnand %p199_p3, %p193_p0 }
   0xa   :  { %203 = shalt.err (!%p200_p4)  }
   0xb   :  { %s293_s25 = smov [#allocation7]  }
   0xc   :  { %15 = dma.vmem_to_smem %s13_s23, 16, %s293_s25, [#allocation5] }
   0xd   :  { %276 = dma.done.wait [#allocation5], 32 }
   0xe   :  { %277 = vsyncadd [#allocation5], 4294967264 }
   0xf   :  { %17 = sfence }
  0x10   :  { %18 = vsyncpa [#allocation9], 0  ;;  %s334_s26 = smov 0  }
  0x11 LB: > { %s29_s0 = sld [smem:[#allocation6 + %s286_s26]]  ;;  %s33_s27 = scalar_lea.vmem [#allocation2], %s286_s26  ;;  %s286_s26 = sphi %s334_s26, %s27_s26  }
  0x12   : > { %s341_s1 = sld [smem:[#allocation7 + %s286_s26]]  ;;  %s41_s28 = sshll.u32 %s33_s27, 4  ;;  %s42_s28 = int_to_ptr.vmem [resolvable:$true] %s41_s28 }
  0x13   : > { %s47_s29 = scalar_lea.vmem [#allocation3], %s286_s26  ;;  %s206_s14 = scalar_lea.hbm %s381_s3, 384 }
  0x14   : > { %s56_s30 = sshll.u32 %s47_s29, 4  ;;  %s345_s30 = int_to_ptr.vmem [resolvable:$true] %s56_s30 }
  0x17   : > { %s152_s6 = sshll.u32 %s29_s0, 4 }
  0x18   : > { %s32_s9 = scalar_lea.hbm %s381_s3, %s152_s6  ;;  %s153_s10 = sshll.u32 %s341_s1, 4 }
  0x19   : > { %s204_s11 = scalar_lea.hbm %s32_s9, 16  ;;  %p207_p6 = scmp.lt.s32.totalorder %s32_s9, %s381_s3 }
  0x1a   : > { %p205_p5 = scmp.ne.s32.totalorder %s32_s9, %s204_s11  ;;  %p208_p7 = scmp.lt.s32.totalorder %s206_s14, %s204_s11 }
  0x1c   : > { %p209_p8 = por %p208_p7, %p207_p6 }
  0x1e   : > { %p210_p9 = pnand %p209_p8, %p205_p5 }
  0x20   : > { %213 = shalt.err (!%p210_p9)  }
  0x21   : > { %s214_s17 = scalar_lea.vmem %s42_s28, 16  ;;  %s294_s18 = smov [#allocation2]  }
  0x22   : > { %p215_p10 = scmp.ne.s32.totalorder %s42_s28, %s214_s17  ;;  %s216_s19 = sshll.u32 %s294_s18, 4  ;;  %s217_s19 = int_to_ptr.vmem [resolvable:$false] %s216_s19 }
  0x23   : > { %s218_s20 = scalar_lea.vmem %s217_s19, 128  ;;  %p219_p11 = scmp.lt.s32.totalorder %s42_s28, %s217_s19 }
  0x24   : > { %p220_p12 = scmp.lt.s32.totalorder %s218_s20, %s214_s17 }
  0x26   : > { %p221_p13 = por %p220_p12, %p219_p11 }
  0x28   : > { %p222_p0 = pnand %p221_p13, %p215_p10 }
  0x2a   : > { %225 = shalt.err (!%p222_p0)  }
  0x2b   : > { %44 = dma.hbm_to_vmem [thread:$0]  %s32_s9, 16, %s42_s28, [#allocation4] }
  0x2c   : > { %s46_s23 = scalar_lea.hbm %s382_s4, %s153_s10  ;;  %s228_s1 = scalar_lea.hbm %s382_s4, 256 }
  0x2d   : > { %s226_s24 = scalar_lea.hbm %s46_s23, 16  ;;  %p229_p2 = scmp.lt.s32.totalorder %s46_s23, %s382_s4 }
  0x2e   : > { %p227_p1 = scmp.ne.s32.totalorder %s46_s23, %s226_s24  ;;  %p230_p3 = scmp.lt.s32.totalorder %s228_s1, %s226_s24 }
  0x30   : > { %p231_p4 = por %p230_p3, %p229_p2 }
  0x32   : > { %p232_p5 = pnand %p231_p4, %p227_p1 }
  0x34   : > { %235 = shalt.err (!%p232_p5)  }
  0x35   : > { %s236_s28 = scalar_lea.vmem %s345_s30, 16  ;;  %s295_s6 = smov [#allocation3]  }
  0x36   : > { %p237_p6 = scmp.ne.s32.totalorder %s345_s30, %s236_s28  ;;  %s238_s7 = sshll.u32 %s295_s6, 4  ;;  %s239_s7 = int_to_ptr.vmem [resolvable:$false] %s238_s7 }
  0x37   : > { %s240_s8 = scalar_lea.vmem %s239_s7, 128  ;;  %p241_p7 = scmp.lt.s32.totalorder %s345_s30, %s239_s7 }
  0x38   : > { %p242_p8 = scmp.lt.s32.totalorder %s240_s8, %s236_s28 }
  0x3a   : > { %p243_p9 = por %p242_p8, %p241_p7 }
  0x3c   : > { %p244_p10 = pnand %p243_p9, %p237_p6 }
  0x3e   : > { %247 = shalt.err (!%p244_p10)  }
  0x3f   : > { %59 = dma.hbm_to_vmem [thread:$0]  %s46_s23, 16, %s345_s30, [#allocation4 + $0x1] }
  0x40   : > { %s27_s26 = sadd.s32 1, %s286_s26  }
  0x41   : > { %p24_p11 = scmp.ge.s32.totalorder %s27_s26, 8  }
  0x42   :  { %s288_s9 = smov (%p24_p11), 0  }
  0x43   :  { %26 = sbr.rel (!%p24_p11) target bundleno = 17 (0x11), region = 53 }
  0x48 LB: > { %278 = dma.done.wait [#allocation4], 16  ;;  %s290_s9 = sphi %s288_s9, %s65_s9  }
  0x49   : > { %279 = vsyncadd [#allocation4], 4294967280 }
  0x4a   : > { %280 = dma.done.wait [#allocation4 + $0x1], 16 }
  0x4b   : > { %281 = vsyncadd [#allocation4 + $0x1], 4294967280  ;;  %s65_s9 = sadd.s32 1, %s290_s9  }
  0x4c   : > { %p62_p12 = scmp.ge.s32.totalorder %s65_s9, 8  }
  0x4d   :  { %v72_v0 = vld [vmem:[#allocation2] sm:$0xff] (%p62_p12)  ;;  %v73_v1 = vld [vmem:[#allocation3] sm:$0xff] (%p62_p12)  ;;  %vm75_vm0 = vcmask (%p62_p12), 261120   ;;  %v296_v5 = vmov (%p62_p12), 0   ;;  %v100_v13 = vlaneseq (%p62_p12)  ;;  %s297_s3 = smov (%p62_p12), [#allocation8]   ;;  %vm107_vm1 = vcmask (%p62_p12), 57344  }
  0x4e   :  { %64 = sbr.rel (!%p62_p12) target bundleno = 72 (0x48), region = 64  ;;  %v74_v2 = vmul.f32 (%p62_p12), %v73_v1, %v72_v0  ;;  %v154_v4 = vld [vmem:[%s380_s2] ss:$0 sm:$0xff] (%p62_p12)  ;;  %178 = vset.pattern.permute.xlu1 (%p62_p12), %v296_v5  ;;  %179 = vset.pattern.permute.xlu0 (%p62_p12), %v296_v5  ;;  %s115_s2 = sshll.u32 (%p62_p12), %s297_s3, 4  ;;  %s116_s2 = int_to_ptr.vmem [resolvable:$true] %s115_s2 }
  0x4f   :  { %v101_v14 = vand.u32 (%p62_p12), 127, %v100_v13  ;;  %v103_v15 = vshrl.u32 (%p62_p12), %v100_v13, 7  ;;  %s248_s4 = scalar_lea.vmem (%p62_p12), %s116_s2, 16  ;;  %s252_s10 = scalar_lea.vmem (%p62_p12), %s116_s2, 32 }
  0x50   :  { %v76_v3 = vsel (%p62_p12), %vm75_vm0, %v74_v2, 0.0  ;;  %p249_p13 = scmp.ne.s32.totalorder (%p62_p12), %s116_s2, %s248_s4  ;;  %p253_p0 = scmp.lt.s32.totalorder (%p62_p12), %s116_s2, %s116_s2 }
  0x51   :  { %77 = vadd.xlane.f32.xlu0 (%p62_p12), %v76_v3  ;;  %v104_v16 = vsub.s32 (%p62_p12), %v101_v14, %v103_v15  ;;  %p254_p1 = scmp.lt.s32.totalorder (%p62_p12), %s252_s10, %s248_s4 }
  0x53   :  { %p255_p2 = por %p254_p1, %p253_p0 }
  0x55   :  { %p256_p3 = pnand %p255_p2, %p249_p13 }
  0x67   :  { %86 = vbcast.lane.b32.xlu0 %v154_v4, 256 }
  0xda   :  { %v78_v6 = vpop.xlane.xlu0 %77 }
  0xde   :  { %v87_v7 = vpop.permute.xlu0 %86 }
  0xdf   :  { %v89_v8 = vadd.f32 %v87_v7, %v78_v6 }
  0xe1   :  { %v155_v9 = vmul.f32 -1.442695, %v89_v8 }
  0xe3   :  { %180 = vpow2.f32 %v155_v9 }
  0xf0   :  { %v181_v10 = vpop.eup %180 }
  0xf1   :  { %v93_v11 = vadd.f32 1.0, %v181_v10 }
  0xf3   :  { %182 = vrcp.f32 %v93_v11 }
 0x100   :  { %v183_v12 = vpop.eup %182 }
 0x101   :  { %98 = vperm.xlu1 %178, %v183_v12  }
 0x17c   :  { %v99_v17 = vpop.permute.xlu1 %98 }
 0x17d   :  { %v105_v18 = vrot.slane %v99_v17, %v104_v16 }
 0x17f   :  { %108 = vst.msk [vmem:[#allocation8] sm:$0x1] %vm107_vm1, %v105_v18 }
 0x180   :  { %259 = shalt.err (!%p256_p3)
}
 0x181   :  { %118 = dma.vmem_to_hbm [thread:$0]  %s116_s2, 16, %s383_s5, [#allocation9]  }
 0x182   :  { %282 = dma.done.wait [#allocation9], 16  }
 0x183   :  { %283 = vsyncadd [#allocation9], 4294967280 }
 0x184   :  { %122 = vsyncpa [#allocation9], 1 }
 0x185   :  { %123 = vsyncmov [#allocation4] }
 0x188   :  { %s124_s13 = vpop.sfrf %123 }
 0x189   :  { %p156_p4 = scmp.ne.s32.totalorder %s124_s13, 0 }
 0x18b   :  { %128 = shalt.err (%p156_p4)  }
 0x18c   :  { %130 = vsyncmov [#allocation4 + $0x1] }
 0x18f   :  { %s131_s14 = vpop.sfrf %130 }
 0x190   :  { %p157_p5 = scmp.ne.s32.totalorder %s131_s14, 0 }
 0x192   :  { %135 = shalt.err (%p157_p5)  }

</bundles_post_ra>
